<compile_context>
chip_gen: v7x
topology: tpu7x:2x2x1
jax: 0.10.0
libtpu: 0.0.40
codegen_flags: <defaults>
</compile_context>

<pallas_src>
import math
import jax
import jax.numpy as jnp
from jax.experimental import pallas as pl
from jax.experimental.pallas import tpu as pltpu


def _make_lstm_kernel(T, Bp, H):
    """Build the kernel with static T / padded-batch Bp / H baked in."""

    def kernel(x_ref, wi_ref, wh_ref, b_ref, out_ref):
        # ---- prologue: hoisted input projection for all timesteps at once ----
        #   (T*Bp, D) @ (D, 4H) + (1, 4H) -> (T*Bp, 4H); bi+bh already folded.
        preact_x = (
            jnp.dot(x_ref[...], wi_ref[...], preferred_element_type=jnp.float32)
            + b_ref[...]
        )
        wh = wh_ref[...]  # (H, 4H), loaded into vregs once, reused every step

        h = jnp.zeros((Bp, H), jnp.float32)
        c = jnp.zeros((Bp, H), jnp.float32)

        hs = []
        # Fully-unrolled static time loop (T is small).  Per step: one small
        # recurrent matmul on an aligned (8, .) tile + batched gate math.
        for t in range(T):
            preact = preact_x[t * Bp:(t + 1) * Bp, :] + jnp.dot(
                h, wh, preferred_element_type=jnp.float32
            )
            # gate order of the PyTorch module: [i, f, o, g]
            # -> the three sigmoid gates are lane-contiguous: one sigmoid pass.
            sig = jax.nn.sigmoid(preact[:, :3 * H])
            g_t = jnp.tanh(preact[:, 3 * H:])
            i_t = sig[:, 0 * H:1 * H]
            f_t = sig[:, 1 * H:2 * H]
            o_t = sig[:, 2 * H:3 * H]

            c = f_t * c + i_t * g_t
            h = o_t * jnp.tanh(c)
            hs.append(h)

        # Single coalesced epilogue store of all timesteps.
        out_ref[...] = jnp.concatenate(hs, axis=0).astype(out_ref.dtype)

    return kernel


def lstm_forward(input_, w_i2h, b_i2h, w_h2h, b_h2h):
    """input_: (1, T, B, D_in) float32. Returns stacked h_t: (1, T, B, H)."""
    _, T, B, D = input_.shape
    H = w_h2h.shape[1]

    # Pad batch to one full sublane tile (8 rows for f32) so every per-step
    # slice / matmul / store inside the kernel is whole-vreg aligned.
    Bp = max(8, B)
    x = input_.reshape(T, B, D)
    x_pad = (
        jnp.zeros((T, Bp, D), input_.dtype).at[:, :B, :].set(x).reshape(T * Bp, D)
    )

    wi_t = w_i2h.T                              # (D, 4H)
    wh_t = w_h2h.T                              # (H, 4H)
    bias = (b_i2h + b_h2h).reshape(1, 4 * H)    # folded bias

    out = pl.pallas_call(
        _make_lstm_kernel(T, Bp, H),
        out_shape=jax.ShapeDtypeStruct((T * Bp, H), jnp.float32),
        # Single invocation (no grid): every operand is one full-array VMEM
        # block; everything here is a few KB, far under the VMEM limit on
        # every generation (v5e/v6e 128 MiB, v7x 64 MiB).
        in_specs=[
            pl.BlockSpec(memory_space=pltpu.MemorySpace.VMEM),  # x_pad (T*Bp, D)
            pl.BlockSpec(memory_space=pltpu.MemorySpace.VMEM),  # Wi^T  (D, 4H)
            pl.BlockSpec(memory_space=pltpu.MemorySpace.VMEM),  # Wh^T  (H, 4H)
            pl.BlockSpec(memory_space=pltpu.MemorySpace.VMEM),  # bias  (1, 4H)
        ],
        out_specs=pl.BlockSpec(memory_space=pltpu.MemorySpace.VMEM),
    )(x_pad, wi_t, wh_t, bias)

    # Drop padded batch rows and restore (1, T, B, H).
    return out.reshape(T, Bp, H)[:, :B, :].reshape(1, T, B, H)


def lstm_reference(input_, w_i2h, b_i2h, w_h2h, b_h2h):
    """Pure-JAX reference matching the (intended) PyTorch semantics."""
    _, T, B, D = input_.shape
    H = w_h2h.shape[1]
    h = jnp.zeros((B, H), jnp.float32)
    c = jnp.zeros((B, H), jnp.float32)
    outs = []
    for t in range(T):
        x = input_[0, t]                          # (B, D)
        preact = x @ w_i2h.T + b_i2h + h @ w_h2h.T + b_h2h
        i_t = jax.nn.sigmoid(preact[:, 0 * H:1 * H])
        f_t = jax.nn.sigmoid(preact[:, 1 * H:2 * H])
        o_t = jax.nn.sigmoid(preact[:, 2 * H:3 * H])
        g_t = jnp.tanh(preact[:, 3 * H:])
        c = c * f_t + i_t * g_t
        h = o_t * jnp.tanh(c)
        outs.append(h)
    return jnp.stack(outs, axis=0).reshape(1, T, B, H)


if __name__ == "__main__":
    # Small deterministic setup: seq=8, batch=2, input_size=16, hidden=32
    T, B, D_IN, H = 8, 2, 16, 32
    key = jax.random.PRNGKey(0)
    k_x, k_wi, k_bi, k_wh, k_bh = jax.random.split(key, 5)

    std = 1.0 / math.sqrt(H)   # matches LSTMCell.reset_parameters
    w_i2h = jax.random.uniform(k_wi, (4 * H, D_IN), jnp.float32, -std, std)
    b_i2h = jax.random.uniform(k_bi, (4 * H,), jnp.float32, -std, std)
    w_h2h = jax.random.uniform(k_wh, (4 * H, H), jnp.float32, -std, std)
    b_h2h = jax.random.uniform(k_bh, (4 * H,), jnp.float32, -std, std)

    input_ = jax.random.normal(k_x, (1, T, B, D_IN), jnp.float32)

    out = lstm_forward(input_, w_i2h, b_i2h, w_h2h, b_h2h)
    jax.block_until_ready(out)

    ref = lstm_reference(input_, w_i2h, b_i2h, w_h2h, b_h2h)
    assert out.shape == (1, T, B, H)
    assert jnp.allclose(out, ref, atol=1e-5, rtol=1e-5), "mismatch vs reference"

    print("KERNEL_OK")
</pallas_src>

<mosaic_0001>
module attributes {stable_mosaic.version = 11 : i64} {
  func.func @kernel(%arg0: memref<64x16xf32, #tpu.memory_space<vmem>>, %arg1: memref<16x128xf32, #tpu.memory_space<vmem>>, %arg2: memref<32x128xf32, #tpu.memory_space<vmem>>, %arg3: memref<1x128xf32, #tpu.memory_space<vmem>>, %arg4: memref<64x32xf32, #tpu.memory_space<vmem>>) attributes {dimension_semantics = [], scalar_prefetch = 0 : i64, scratch_operands = 0 : i64, tpu.core_type = #tpu.core_type<tc>} {
    %c0 = arith.constant 0 : index
    %c0_0 = arith.constant 0 : index
    %0 = vector.load %arg0[%c0, %c0_0] : memref<64x16xf32, #tpu.memory_space<vmem>>, vector<64x16xf32>
    %c0_1 = arith.constant 0 : index
    %c0_2 = arith.constant 0 : index
    %1 = vector.load %arg1[%c0_1, %c0_2] : memref<16x128xf32, #tpu.memory_space<vmem>>, vector<16x128xf32>
    %cst = arith.constant dense<0.000000e+00> : vector<64x128xf32>
    %2 = tpu.matmul %0, %1, %cst {dimension_numbers = #tpu.dot_dimension_numbers<[1], [0], [0], [1], [0, 0, 1, 1], [], []>} : vector<64x16xf32>, vector<16x128xf32>, vector<64x128xf32> -> vector<64x128xf32>
    %c0_3 = arith.constant 0 : index
    %c0_4 = arith.constant 0 : index
    %3 = vector.load %arg3[%c0_3, %c0_4] : memref<1x128xf32, #tpu.memory_space<vmem>>, vector<1x128xf32>
    %4 = vector.broadcast %3 : vector<1x128xf32> to vector<64x128xf32>
    %5 = arith.addf %2, %4 : vector<64x128xf32>
    %c0_5 = arith.constant 0 : index
    %c0_6 = arith.constant 0 : index
    %6 = vector.load %arg2[%c0_5, %c0_6] : memref<32x128xf32, #tpu.memory_space<vmem>>, vector<32x128xf32>
    %cst_7 = arith.constant 0.000000e+00 : f32
    %7 = vector.broadcast %cst_7 : f32 to vector<8x32xf32>
    %cst_8 = arith.constant 0.000000e+00 : f32
    %8 = vector.broadcast %cst_8 : f32 to vector<8x32xf32>
    %9 = vector.extract_strided_slice %5 {offsets = [0, 0], sizes = [8, 128], strides = [1, 1]} : vector<64x128xf32> to vector<8x128xf32>
    %cst_9 = arith.constant dense<0.000000e+00> : vector<8x128xf32>
    %10 = tpu.matmul %7, %6, %cst_9 {dimension_numbers = #tpu.dot_dimension_numbers<[1], [0], [0], [1], [0, 0, 1, 1], [], []>} : vector<8x32xf32>, vector<32x128xf32>, vector<8x128xf32> -> vector<8x128xf32>
    %11 = arith.addf %9, %10 : vector<8x128xf32>
    %12 = vector.extract_strided_slice %11 {offsets = [0, 0], sizes = [8, 96], strides = [1, 1]} : vector<8x128xf32> to vector<8x96xf32>
    %13 = arith.negf %12 : vector<8x96xf32>
    %14 = math.exp %13 : vector<8x96xf32>
    %cst_10 = arith.constant 1.000000e+00 : f32
    %15 = vector.broadcast %cst_10 : f32 to vector<8x96xf32>
    %16 = arith.addf %15, %14 : vector<8x96xf32>
    %17 = arith.divf %15, %16 : vector<8x96xf32>
    %18 = vector.extract_strided_slice %11 {offsets = [0, 96], sizes = [8, 32], strides = [1, 1]} : vector<8x128xf32> to vector<8x32xf32>
    %19 = math.tanh %18 : vector<8x32xf32>
    %20 = vector.extract_strided_slice %17 {offsets = [0, 0], sizes = [8, 32], strides = [1, 1]} : vector<8x96xf32> to vector<8x32xf32>
    %21 = vector.extract_strided_slice %17 {offsets = [0, 32], sizes = [8, 32], strides = [1, 1]} : vector<8x96xf32> to vector<8x32xf32>
    %22 = vector.extract_strided_slice %17 {offsets = [0, 64], sizes = [8, 32], strides = [1, 1]} : vector<8x96xf32> to vector<8x32xf32>
    %23 = arith.mulf %21, %8 : vector<8x32xf32>
    %24 = arith.mulf %20, %19 : vector<8x32xf32>
    %25 = arith.addf %23, %24 : vector<8x32xf32>
    %26 = math.tanh %25 : vector<8x32xf32>
    %27 = arith.mulf %22, %26 : vector<8x32xf32>
    %28 = vector.extract_strided_slice %5 {offsets = [8, 0], sizes = [8, 128], strides = [1, 1]} : vector<64x128xf32> to vector<8x128xf32>
    %cst_11 = arith.constant dense<0.000000e+00> : vector<8x128xf32>
    %29 = tpu.matmul %27, %6, %cst_11 {dimension_numbers = #tpu.dot_dimension_numbers<[1], [0], [0], [1], [0, 0, 1, 1], [], []>} : vector<8x32xf32>, vector<32x128xf32>, vector<8x128xf32> -> vector<8x128xf32>
    %30 = arith.addf %28, %29 : vector<8x128xf32>
    %31 = vector.extract_strided_slice %30 {offsets = [0, 0], sizes = [8, 96], strides = [1, 1]} : vector<8x128xf32> to vector<8x96xf32>
    %32 = arith.negf %31 : vector<8x96xf32>
    %33 = math.exp %32 : vector<8x96xf32>
    %cst_12 = arith.constant 1.000000e+00 : f32
    %34 = vector.broadcast %cst_12 : f32 to vector<8x96xf32>
    %35 = arith.addf %34, %33 : vector<8x96xf32>
    %36 = arith.divf %34, %35 : vector<8x96xf32>
    %37 = vector.extract_strided_slice %30 {offsets = [0, 96], sizes = [8, 32], strides = [1, 1]} : vector<8x128xf32> to vector<8x32xf32>
    %38 = math.tanh %37 : vector<8x32xf32>
    %39 = vector.extract_strided_slice %36 {offsets = [0, 0], sizes = [8, 32], strides = [1, 1]} : vector<8x96xf32> to vector<8x32xf32>
    %40 = vector.extract_strided_slice %36 {offsets = [0, 32], sizes = [8, 32], strides = [1, 1]} : vector<8x96xf32> to vector<8x32xf32>
    %41 = vector.extract_strided_slice %36 {offsets = [0, 64], sizes = [8, 32], strides = [1, 1]} : vector<8x96xf32> to vector<8x32xf32>
    %42 = arith.mulf %40, %25 : vector<8x32xf32>
    %43 = arith.mulf %39, %38 : vector<8x32xf32>
    %44 = arith.addf %42, %43 : vector<8x32xf32>
    %45 = math.tanh %44 : vector<8x32xf32>
    %46 = arith.mulf %41, %45 : vector<8x32xf32>
    %47 = vector.extract_strided_slice %5 {offsets = [16, 0], sizes = [8, 128], strides = [1, 1]} : vector<64x128xf32> to vector<8x128xf32>
    %cst_13 = arith.constant dense<0.000000e+00> : vector<8x128xf32>
    %48 = tpu.matmul %46, %6, %cst_13 {dimension_numbers = #tpu.dot_dimension_numbers<[1], [0], [0], [1], [0, 0, 1, 1], [], []>} : vector<8x32xf32>, vector<32x128xf32>, vector<8x128xf32> -> vector<8x128xf32>
    %49 = arith.addf %47, %48 : vector<8x128xf32>
    %50 = vector.extract_strided_slice %49 {offsets = [0, 0], sizes = [8, 96], strides = [1, 1]} : vector<8x128xf32> to vector<8x96xf32>
    %51 = arith.negf %50 : vector<8x96xf32>
    %52 = math.exp %51 : vector<8x96xf32>
    %cst_14 = arith.constant 1.000000e+00 : f32
    %53 = vector.broadcast %cst_14 : f32 to vector<8x96xf32>
    %54 = arith.addf %53, %52 : vector<8x96xf32>
    %55 = arith.divf %53, %54 : vector<8x96xf32>
    %56 = vector.extract_strided_slice %49 {offsets = [0, 96], sizes = [8, 32], strides = [1, 1]} : vector<8x128xf32> to vector<8x32xf32>
    %57 = math.tanh %56 : vector<8x32xf32>
    %58 = vector.extract_strided_slice %55 {offsets = [0, 0], sizes = [8, 32], strides = [1, 1]} : vector<8x96xf32> to vector<8x32xf32>
    %59 = vector.extract_strided_slice %55 {offsets = [0, 32], sizes = [8, 32], strides = [1, 1]} : vector<8x96xf32> to vector<8x32xf32>
    %60 = vector.extract_strided_slice %55 {offsets = [0, 64], sizes = [8, 32], strides = [1, 1]} : vector<8x96xf32> to vector<8x32xf32>
    %61 = arith.mulf %59, %44 : vector<8x32xf32>
    %62 = arith.mulf %58, %57 : vector<8x32xf32>
    %63 = arith.addf %61, %62 : vector<8x32xf32>
    %64 = math.tanh %63 : vector<8x32xf32>
    %65 = arith.mulf %60, %64 : vector<8x32xf32>
    %66 = vector.extract_strided_slice %5 {offsets = [24, 0], sizes = [8, 128], strides = [1, 1]} : vector<64x128xf32> to vector<8x128xf32>
    %cst_15 = arith.constant dense<0.000000e+00> : vector<8x128xf32>
    %67 = tpu.matmul %65, %6, %cst_15 {dimension_numbers = #tpu.dot_dimension_numbers<[1], [0], [0], [1], [0, 0, 1, 1], [], []>} : vector<8x32xf32>, vector<32x128xf32>, vector<8x128xf32> -> vector<8x128xf32>
    %68 = arith.addf %66, %67 : vector<8x128xf32>
    %69 = vector.extract_strided_slice %68 {offsets = [0, 0], sizes = [8, 96], strides = [1, 1]} : vector<8x128xf32> to vector<8x96xf32>
    %70 = arith.negf %69 : vector<8x96xf32>
    %71 = math.exp %70 : vector<8x96xf32>
    %cst_16 = arith.constant 1.000000e+00 : f32
    %72 = vector.broadcast %cst_16 : f32 to vector<8x96xf32>
    %73 = arith.addf %72, %71 : vector<8x96xf32>
    %74 = arith.divf %72, %73 : vector<8x96xf32>
    %75 = vector.extract_strided_slice %68 {offsets = [0, 96], sizes = [8, 32], strides = [1, 1]} : vector<8x128xf32> to vector<8x32xf32>
    %76 = math.tanh %75 : vector<8x32xf32>
    %77 = vector.extract_strided_slice %74 {offsets = [0, 0], sizes = [8, 32], strides = [1, 1]} : vector<8x96xf32> to vector<8x32xf32>
    %78 = vector.extract_strided_slice %74 {offsets = [0, 32], sizes = [8, 32], strides = [1, 1]} : vector<8x96xf32> to vector<8x32xf32>
    %79 = vector.extract_strided_slice %74 {offsets = [0, 64], sizes = [8, 32], strides = [1, 1]} : vector<8x96xf32> to vector<8x32xf32>
    %80 = arith.mulf %78, %63 : vector<8x32xf32>
    %81 = arith.mulf %77, %76 : vector<8x32xf32>
    %82 = arith.addf %80, %81 : vector<8x32xf32>
    %83 = math.tanh %82 : vector<8x32xf32>
    %84 = arith.mulf %79, %83 : vector<8x32xf32>
    %85 = vector.extract_strided_slice %5 {offsets = [32, 0], sizes = [8, 128], strides = [1, 1]} : vector<64x128xf32> to vector<8x128xf32>
    %cst_17 = arith.constant dense<0.000000e+00> : vector<8x128xf32>
    %86 = tpu.matmul %84, %6, %cst_17 {dimension_numbers = #tpu.dot_dimension_numbers<[1], [0], [0], [1], [0, 0, 1, 1], [], []>} : vector<8x32xf32>, vector<32x128xf32>, vector<8x128xf32> -> vector<8x128xf32>
    %87 = arith.addf %85, %86 : vector<8x128xf32>
    %88 = vector.extract_strided_slice %87 {offsets = [0, 0], sizes = [8, 96], strides = [1, 1]} : vector<8x128xf32> to vector<8x96xf32>
    %89 = arith.negf %88 : vector<8x96xf32>
    %90 = math.exp %89 : vector<8x96xf32>
    %cst_18 = arith.constant 1.000000e+00 : f32
    %91 = vector.broadcast %cst_18 : f32 to vector<8x96xf32>
    %92 = arith.addf %91, %90 : vector<8x96xf32>
    %93 = arith.divf %91, %92 : vector<8x96xf32>
    %94 = vector.extract_strided_slice %87 {offsets = [0, 96], sizes = [8, 32], strides = [1, 1]} : vector<8x128xf32> to vector<8x32xf32>
    %95 = math.tanh %94 : vector<8x32xf32>
    %96 = vector.extract_strided_slice %93 {offsets = [0, 0], sizes = [8, 32], strides = [1, 1]} : vector<8x96xf32> to vector<8x32xf32>
    %97 = vector.extract_strided_slice %93 {offsets = [0, 32], sizes = [8, 32], strides = [1, 1]} : vector<8x96xf32> to vector<8x32xf32>
    %98 = vector.extract_strided_slice %93 {offsets = [0, 64], sizes = [8, 32], strides = [1, 1]} : vector<8x96xf32> to vector<8x32xf32>
    %99 = arith.mulf %97, %82 : vector<8x32xf32>
    %100 = arith.mulf %96, %95 : vector<8x32xf32>
    %101 = arith.addf %99, %100 : vector<8x32xf32>
    %102 = math.tanh %101 : vector<8x32xf32>
    %103 = arith.mulf %98, %102 : vector<8x32xf32>
    %104 = vector.extract_strided_slice %5 {offsets = [40, 0], sizes = [8, 128], strides = [1, 1]} : vector<64x128xf32> to vector<8x128xf32>
    %cst_19 = arith.constant dense<0.000000e+00> : vector<8x128xf32>
    %105 = tpu.matmul %103, %6, %cst_19 {dimension_numbers = #tpu.dot_dimension_numbers<[1], [0], [0], [1], [0, 0, 1, 1], [], []>} : vector<8x32xf32>, vector<32x128xf32>, vector<8x128xf32> -> vector<8x128xf32>
    %106 = arith.addf %104, %105 : vector<8x128xf32>
    %107 = vector.extract_strided_slice %106 {offsets = [0, 0], sizes = [8, 96], strides = [1, 1]} : vector<8x128xf32> to vector<8x96xf32>
    %108 = arith.negf %107 : vector<8x96xf32>
    %109 = math.exp %108 : vector<8x96xf32>
    %cst_20 = arith.constant 1.000000e+00 : f32
    %110 = vector.broadcast %cst_20 : f32 to vector<8x96xf32>
    %111 = arith.addf %110, %109 : vector<8x96xf32>
    %112 = arith.divf %110, %111 : vector<8x96xf32>
    %113 = vector.extract_strided_slice %106 {offsets = [0, 96], sizes = [8, 32], strides = [1, 1]} : vector<8x128xf32> to vector<8x32xf32>
    %114 = math.tanh %113 : vector<8x32xf32>
    %115 = vector.extract_strided_slice %112 {offsets = [0, 0], sizes = [8, 32], strides = [1, 1]} : vector<8x96xf32> to vector<8x32xf32>
    %116 = vector.extract_strided_slice %112 {offsets = [0, 32], sizes = [8, 32], strides = [1, 1]} : vector<8x96xf32> to vector<8x32xf32>
    %117 = vector.extract_strided_slice %112 {offsets = [0, 64], sizes = [8, 32], strides = [1, 1]} : vector<8x96xf32> to vector<8x32xf32>
    %118 = arith.mulf %116, %101 : vector<8x32xf32>
    %119 = arith.mulf %115, %114 : vector<8x32xf32>
    %120 = arith.addf %118, %119 : vector<8x32xf32>
    %121 = math.tanh %120 : vector<8x32xf32>
    %122 = arith.mulf %117, %121 : vector<8x32xf32>
    %123 = vector.extract_strided_slice %5 {offsets = [48, 0], sizes = [8, 128], strides = [1, 1]} : vector<64x128xf32> to vector<8x128xf32>
    %cst_21 = arith.constant dense<0.000000e+00> : vector<8x128xf32>
    %124 = tpu.matmul %122, %6, %cst_21 {dimension_numbers = #tpu.dot_dimension_numbers<[1], [0], [0], [1], [0, 0, 1, 1], [], []>} : vector<8x32xf32>, vector<32x128xf32>, vector<8x128xf32> -> vector<8x128xf32>
    %125 = arith.addf %123, %124 : vector<8x128xf32>
    %126 = vector.extract_strided_slice %125 {offsets = [0, 0], sizes = [8, 96], strides = [1, 1]} : vector<8x128xf32> to vector<8x96xf32>
    %127 = arith.negf %126 : vector<8x96xf32>
    %128 = math.exp %127 : vector<8x96xf32>
    %cst_22 = arith.constant 1.000000e+00 : f32
    %129 = vector.broadcast %cst_22 : f32 to vector<8x96xf32>
    %130 = arith.addf %129, %128 : vector<8x96xf32>
    %131 = arith.divf %129, %130 : vector<8x96xf32>
    %132 = vector.extract_strided_slice %125 {offsets = [0, 96], sizes = [8, 32], strides = [1, 1]} : vector<8x128xf32> to vector<8x32xf32>
    %133 = math.tanh %132 : vector<8x32xf32>
    %134 = vector.extract_strided_slice %131 {offsets = [0, 0], sizes = [8, 32], strides = [1, 1]} : vector<8x96xf32> to vector<8x32xf32>
    %135 = vector.extract_strided_slice %131 {offsets = [0, 32], sizes = [8, 32], strides = [1, 1]} : vector<8x96xf32> to vector<8x32xf32>
    %136 = vector.extract_strided_slice %131 {offsets = [0, 64], sizes = [8, 32], strides = [1, 1]} : vector<8x96xf32> to vector<8x32xf32>
    %137 = arith.mulf %135, %120 : vector<8x32xf32>
    %138 = arith.mulf %134, %133 : vector<8x32xf32>
    %139 = arith.addf %137, %138 : vector<8x32xf32>
    %140 = math.tanh %139 : vector<8x32xf32>
    %141 = arith.mulf %136, %140 : vector<8x32xf32>
    %142 = vector.extract_strided_slice %5 {offsets = [56, 0], sizes = [8, 128], strides = [1, 1]} : vector<64x128xf32> to vector<8x128xf32>
    %cst_23 = arith.constant dense<0.000000e+00> : vector<8x128xf32>
    %143 = tpu.matmul %141, %6, %cst_23 {dimension_numbers = #tpu.dot_dimension_numbers<[1], [0], [0], [1], [0, 0, 1, 1], [], []>} : vector<8x32xf32>, vector<32x128xf32>, vector<8x128xf32> -> vector<8x128xf32>
    %144 = arith.addf %142, %143 : vector<8x128xf32>
    %145 = vector.extract_strided_slice %144 {offsets = [0, 0], sizes = [8, 96], strides = [1, 1]} : vector<8x128xf32> to vector<8x96xf32>
    %146 = arith.negf %145 : vector<8x96xf32>
    %147 = math.exp %146 : vector<8x96xf32>
    %cst_24 = arith.constant 1.000000e+00 : f32
    %148 = vector.broadcast %cst_24 : f32 to vector<8x96xf32>
    %149 = arith.addf %148, %147 : vector<8x96xf32>
    %150 = arith.divf %148, %149 : vector<8x96xf32>
    %151 = vector.extract_strided_slice %144 {offsets = [0, 96], sizes = [8, 32], strides = [1, 1]} : vector<8x128xf32> to vector<8x32xf32>
    %152 = math.tanh %151 : vector<8x32xf32>
    %153 = vector.extract_strided_slice %150 {offsets = [0, 0], sizes = [8, 32], strides = [1, 1]} : vector<8x96xf32> to vector<8x32xf32>
    %154 = vector.extract_strided_slice %150 {offsets = [0, 32], sizes = [8, 32], strides = [1, 1]} : vector<8x96xf32> to vector<8x32xf32>
    %155 = vector.extract_strided_slice %150 {offsets = [0, 64], sizes = [8, 32], strides = [1, 1]} : vector<8x96xf32> to vector<8x32xf32>
    %156 = arith.mulf %154, %139 : vector<8x32xf32>
    %157 = arith.mulf %153, %152 : vector<8x32xf32>
    %158 = arith.addf %156, %157 : vector<8x32xf32>
    %159 = math.tanh %158 : vector<8x32xf32>
    %160 = arith.mulf %155, %159 : vector<8x32xf32>
    %161 = tpu.concatenate %27, %46, %65, %84, %103, %122, %141, %160 in 0 : vector<8x32xf32>, vector<8x32xf32>, vector<8x32xf32>, vector<8x32xf32>, vector<8x32xf32>, vector<8x32xf32>, vector<8x32xf32>, vector<8x32xf32> -> vector<64x32xf32>
    %c0_25 = arith.constant 0 : index
    %c0_26 = arith.constant 0 : index
    %162 = vector.load %arg4[%c0_25, %c0_26] : memref<64x32xf32, #tpu.memory_space<vmem>>, vector<64x32xf32>
    tpu.vector_store %arg4[%c0_25, %c0_26], %161 {strides = array<i32>} : memref<64x32xf32, #tpu.memory_space<vmem>>, vector<64x32xf32>,
    return
  }
}

</mosaic_0001>

<bundles_post_ra>
// kernel: tpu_custom_call.1
= control target key start
LH: loop header
LB: loop body
LE: loop exit
PB: predicated region body
PF: predicated region fallthrough
CT: control target
= control target key end

     0   :  { %vm34_vm0 = vcmask 130048   ;;  %v1289_v0 = vmov 0.0|0.0   ;;  %vm1290_vm1 = vmmov 0   ;;  %v1291_v4 = vmov 0.0   ;;  %s1292_s5 = smov 32   ;;  %s1518_s1 = inlined_call_operand.vmem [shape: f32[16,128], index: 1, kind: input, shape index: {}]   ;;  %s1519_s2 = inlined_call_operand.vmem [shape: f32[32,128], index: 2, kind: input, shape index: {}]   ;;  %s1520_s0 = inlined_call_operand.vmem [shape: f32[64,16], index: 0, kind: input, shape index: {}]   ;;  %s1521_s3 = inlined_call_operand.vmem [shape: f32[1,128], index: 3, kind: input, shape index: {}]   ;;  %s1522_s4 = inlined_call_operand.vmem [shape: f32[64,32], index: 4, kind: output, shape index: {}]  }
   0x1   :  { %1172 = vmatprep.subr.bf16.mxu1 %v1289_v0  ;;  %v25_v1 = vld [vmem:[%s1518_s1] sm:$0xff]  ;;  %v26_v2 = vld [vmem:[%s1518_s1 + $0x8] sm:$0xff]  ;;  %1088 = vmatprep.mubr.msk.f32.mxu1 %vm1290_vm1, %v1291_v4  ;;  %v166_v9 = vld [vmem:[%s1519_s2 + $0x10] sm:$0xff]  ;;  %vm168_vm2 = vcmask 261120  }
   0x2   :  { %v164_v3 = vld [vmem:[%s1519_s2] sm:$0xff]  ;;  %v1168_v5 = vpack.c.bf16 %v26_v2, %v25_v1  ;;  %v165_v6 = vld [vmem:[%s1519_s2 + $0x8] sm:$0xff]  ;;  %v167_v10 = vld [vmem:[%s1519_s2 + $0x18] sm:$0xff] }
   0x3   :  { %v17_v7 = vld [vmem:[%s1520_s0] sm:$0xff]  ;;  %v1337_v8 = vpack.c.bf16 %v165_v6, %v164_v3  ;;  %v18_v11 = vld [vmem:[%s1520_s0 + $0x8] sm:$0xff]  ;;  %v1350_v12 = vpack.c.bf16 %v167_v10, %v166_v9  ;;  %v19_v48 = vld [vmem:[%s1520_s0 + $0x10] sm:$0xff] }
   0x4   :  { %1068 = vmatprep.mubr.msk.f32.mxu0 %vm34_vm0, %v17_v7  ;;  %1169 = vmatprep.subr.bf16.mxu0 %v1168_v5  ;;  %v1371_v13 = vld [vmem:[%s1521_s3] ss:$0 sm:$0xff]  ;;  %s1293_s3 = smov 64   ;;  %v20_v49 = vld [vmem:[%s1520_s0 + $0x18] sm:$0xff]  ;;  %v22_v51 = vld [vmem:[%s1520_s0 + $0x28] sm:$0xff] }
   0x5   :  { %1174 = vmatpush3.bf16.msra.mxu1 %v1337_v8  ;;  %1171 = vmatpush3.bf16.msra.mxu0 %v1168_v5  ;;  %v21_v50 = vld [vmem:[%s1520_s0 + $0x20] sm:$0xff]  ;;  %v23_v52 = vld [vmem:[%s1520_s0 + $0x30] sm:$0xff]  ;;  %v24_v53 = vld [vmem:[%s1520_s0 + $0x38] sm:$0xff] }
   0x6   :  { %1175 = vmatprep.subr.bf16.mxu1 %v1289_v0  ;;  %1184 = vmatprep.subr.bf16.mxu0 %v1289_v0 }
   0x8   :  { %1069 = vmatmul.mubr.msk.f32.vlgmr.msra.gmra.mrb[0].mxu0 %vm34_vm0, %v18_v11 }
   0x9   :  { %1177 = vmatpush3.bf16.msra.mxu1 %v1350_v12  ;;  %1186 = vmatpush3.bf16.msra.mxu0 %v1337_v8 }
   0xa   :  { %1178 = vmatprep.subr.bf16.mxu1 %v1289_v0  ;;  %1187 = vmatprep.subr.bf16.mxu0 %v1289_v0 }
   0xb   :  { %1071 = vmatprep.mubr.msk.f32.mxu0 %vm34_vm0, %v19_v48 }
   0xc   :  { %1089 = vmatmul.mubr.f32.vlgmr.msra.gmra.mrb[0].mxu1 %v1291_v4  ;;  %1072 = vmatmul.mubr.msk.f32.gmra.mrb[2].mxu0 %vm34_vm0, %v20_v49 }
   0xd   :  { %1180 = vmatpush3.bf16.msra.mxu1 %v1337_v8  ;;  %1099 = vmatprep.mubr.msk.f32.mxu1 %vm1290_vm1, %v1291_v4 }
   0xe   :  { %1181 = vmatprep.subr.bf16.mxu1 %v1289_v0  ;;  %1189 = vmatpush3.bf16.msra.mxu0 %v1350_v12 }
   0xf   :  { %1196 = vmatprep.subr.bf16.mxu0 %v1289_v0  ;;  %1074 = vmatprep.mubr.msk.f32.mxu0 %vm34_vm0, %v21_v50 }
  0x10   :  { %1075 = vmatmul.mubr.msk.f32.gmra.mrb[4].mxu0 %vm34_vm0, %v22_v51 }
  0x11   :  { %1183 = vmatpush3.bf16.msra.mxu1 %v1350_v12  ;;  %1077 = vmatprep.mubr.msk.f32.mxu0 %vm34_vm0, %v23_v52 }
  0x12   :  { %1190 = vmatprep.subr.bf16.mxu1 %v1289_v0 }
  0x14   :  { %1078 = vmatmul.mubr.msk.f32.gmra.mrb[6].mxu0 %vm34_vm0, %v24_v53 }
  0x15   :  { %1110 = vmatprep.mubr.msk.f32.mxu0 %vm1290_vm1, %v1291_v4 }
  0xdb   :  { %v1070_v14 = vpop.f32.mrb[0].mxu0 }
  0xdc   :  { %v125_v15 = vpop.f32.mrb[1].mxu0  ;;  %v131_v34 = vadd.f32 %v1070_v14, %v1371_v13 }
  0xdd   :  { %v126_v16 = vadd.f32 %v1371_v13, %v125_v15 }
  0xdf   :  { %v238_v17 = vpop.f32.mrb[0].mxu1  ;;  %v1073_v57 = vpop.f32.mrb[2].mxu0 }
  0xe0   :  { %v242_v18 = vadd.f32 %v238_v17, %v126_v16  ;;  %v1090_v19 = vpop.f32.mrb[1].mxu1  ;;  %v135_v58 = vpop.f32.mrb[3].mxu0 }
  0xe1   :  { %v136_v1 = vadd.f32 %v1371_v13, %v135_v58 }
  0xe2   :  { %1225 = vtanh.f32 %v242_v18  ;;  %v999_v21 = vmul.f32 -1.442695, %v242_v18 }
  0xe3   :  { %v1420_v59 = vpop.f32.mrb[4].mxu0 }
  0xe4   :  { %1227 = vpow2.f32 %v999_v21  ;;  %v1422_v60 = vpop.f32.mrb[5].mxu0 }
  0xe7   :  { %v1424_v61 = vpop.f32.mrb[6].mxu0 }
  0xe8   :  { %v1426_v62 = vpop.f32.mrb[7].mxu0 }
  0xec   :  { %v1226_v20 = vpop.eup %1225 }
  0xed   :  { %252 = vrot.lane.b32.xlu0 %v1226_v20, %s1292_s5 }
  0xee   :  { %v1228_v22 = vpop.eup %1227 }
  0xef   :  { %v246_v23 = vadd.f32 1.0, %v1228_v22 }
  0xf1   :  { %1229 = vrcp.f32 %v246_v23  ;;  %v141_v23 = vadd.f32 %v1073_v57, %v1371_v13 }
  0xfb   :  { %v1230_v24 = vpop.eup %1229 }
  0xfc   :  { %v250_v27 = vmul.f32 0.0, %v1230_v24 }
 0x15f   :  { %v253_v25 = vpop.permute.xlu0 %252 }
 0x160   :  { %v255_v26 = vmul.f32 %v1230_v24, %v253_v25 }
 0x162   :  { %257 = vrot.lane.b32.xlu0 %v255_v26, %s1292_s5 }
 0x1d4   :  { %v258_v28 = vpop.permute.xlu0 %257 }
 0x1d5   :  { %v260_v29 = vadd.f32 %v258_v28, %v250_v27 }
 0x1d7   :  { %1231 = vtanh.f32 %v260_v29 }
 0x1e1   :  { %v1232_v30 = vpop.eup %1231 }
 0x1e2   :  { %263 = vrot.lane.b32.xlu1 %v1232_v30, %s1292_s5 }
 0x254   :  { %v264_v31 = vpop.permute.xlu1 %263 }
 0x255   :  { %v266_v32 = vmul.f32 %v1230_v24, %v264_v31 }
 0x257   :  { %268 = vrot.lane.b32.xlu1 %v266_v32, %s1293_s3 }
 0x2c9   :  { %v269_v33 = vpop.permute.xlu1 %268 }
 0x2ca   :  { %978 = vst.msk [vmem:[%s1522_s4] sm:$0xff] %vm168_vm2, %v269_v33  ;;  %1100 = vmatmul.mubr.msk.f32.vlgmr.msra.gmra.mrb[2].mxu1 %vm168_vm2, %v269_v33 }
 0x2cb   :  { %1192 = vmatpush3.bf16.msra.mxu1 %v1337_v8  ;;  %1121 = vmatprep.mubr.msk.f32.mxu1 %vm1290_vm1, %v1291_v4 }
 0x2cc   :  { %1193 = vmatprep.subr.bf16.mxu1 %v1289_v0 }
 0x2cf   :  { %1195 = vmatpush3.bf16.msra.mxu1 %v1350_v12 }
 0x2d0   :  { %1202 = vmatprep.subr.bf16.mxu1 %v1289_v0 }
 0x39d   :  { %v338_v35 = vpop.f32.mrb[2].mxu1 }
 0x39e   :  { %v342_v36 = vadd.f32 %v338_v35, %v131_v34  ;;  %v1101_v37 = vpop.f32.mrb[3].mxu1 }
 0x3a0   :  { %1233 = vtanh.f32 %v342_v36  ;;  %v1001_v39 = vmul.f32 -1.442695, %v342_v36 }
 0x3a2   :  { %1235 = vpow2.f32 %v1001_v39 }
 0x3aa   :  { %v1234_v38 = vpop.eup %1233 }
 0x3ab   :  { %352 = vrot.lane.b32.xlu0 %v1234_v38, %s1292_s5 }
 0x3ac   :  { %v1236_v40 = vpop.eup %1235 }
 0x3ad   :  { %v346_v41 = vadd.f32 1.0, %v1236_v40 }
 0x3af   :  { %1237 = vrcp.f32 %v346_v41  ;;  %v146_v41 = vadd.f32 %v1371_v13, %v1422_v60  ;;  %v151_v60 = vadd.f32 %v1420_v59, %v1371_v13 }
 0x3b9   :  { %v1238_v42 = vpop.eup %1237 }
 0x3ba   :  { %v350_v45 = vmul.f32 %v1238_v42, %v260_v29 }
 0x41d   :  { %v353_v43 = vpop.permute.xlu0 %352 }
 0x41e   :  { %v355_v44 = vmul.f32 %v1238_v42, %v353_v43 }
 0x420   :  { %357 = vrot.lane.b32.xlu1 %v355_v44, %s1292_s5 }
 0x492   :  { %v358_v46 = vpop.permute.xlu1 %357 }
 0x493   :  { %v360_v47 = vadd.f32 %v358_v46, %v350_v45 }
 0x495   :  { %1239 = vtanh.f32 %v360_v47 }
 0x49f   :  { %v1240_v54 = vpop.eup %1239 }
 0x4a0   :  { %363 = vrot.lane.b32.xlu0 %v1240_v54, %s1292_s5 }
 0x512   :  { %v364_v55 = vpop.permute.xlu0 %363 }
 0x513   :  { %v366_v56 = vmul.f32 %v1238_v42, %v364_v55 }
 0x515   :  { %368 = vrot.lane.b32.xlu1 %v366_v56, %s1293_s3 }
 0x587   :  { %v369_v63 = vpop.permute.xlu1 %368 }
 0x588   :  { %979 = vst.msk [vmem:[%s1522_s4 + $0x8] sm:$0xff] %vm168_vm2, %v369_v63  ;;  %1111 = vmatmul.mubr.msk.f32.vlgmr.msra.gmra.mrb[8].mxu0 %vm168_vm2, %v369_v63 }
 0x589   :  { %1198 = vmatpush3.bf16.msra.mxu0 %v1337_v8  ;;  %1132 = vmatprep.mubr.msk.f32.mxu0 %vm1290_vm1, %v1291_v4 }
 0x58a   :  { %1199 = vmatprep.subr.bf16.mxu0 %v1289_v0 }
 0x58d   :  { %1201 = vmatpush3.bf16.msra.mxu0 %v1350_v12 }
 0x58e   :  { %1208 = vmatprep.subr.bf16.mxu0 %v1289_v0 }
 0x65b   :  { %v438_v2 = vpop.f32.mrb[8].mxu0 }
 0x65c   :  { %v442_v3 = vadd.f32 %v438_v2, %v136_v1  ;;  %v1112_v5 = vpop.f32.mrb[9].mxu0 }
 0x65e   :  { %1241 = vtanh.f32 %v442_v3  ;;  %v1003_v7 = vmul.f32 -1.442695, %v442_v3 }
 0x660   :  { %1243 = vpow2.f32 %v1003_v7 }
 0x668   :  { %v1242_v6 = vpop.eup %1241 }
 0x669   :  { %452 = vrot.lane.b32.xlu0 %v1242_v6, %s1292_s5 }
 0x66a   :  { %v1244_v9 = vpop.eup %1243 }
 0x66b   :  { %v446_v10 = vadd.f32 1.0, %v1244_v9 }
 0x66d   :  { %1245 = vrcp.f32 %v446_v10 }
 0x677   :  { %v1246_v11 = vpop.eup %1245 }
 0x678   :  { %v450_v16 = vmul.f32 %v1246_v11, %v360_v47 }
 0x6db   :  { %v453_v14 = vpop.permute.xlu0 %452 }
 0x6dc   :  { %v455_v15 = vmul.f32 %v1246_v11, %v453_v14 }
 0x6de   :  { %457 = vrot.lane.b32.xlu1 %v455_v15, %s1292_s5 }
 0x750   :  { %v458_v17 = vpop.permute.xlu1 %457 }
 0x751   :  { %v460_v18 = vadd.f32 %v458_v17, %v450_v16  ;;  %v156_v16 = vadd.f32 %v1371_v13, %v1426_v62 }
 0x753   :  { %1247 = vtanh.f32 %v460_v18 }
 0x75d   :  { %v1248_v19 = vpop.eup %1247 }
 0x75e   :  { %463 = vrot.lane.b32.xlu0 %v1248_v19, %s1292_s5 }
 0x7d0   :  { %v464_v20 = vpop.permute.xlu0 %463 }
 0x7d1   :  { %v466_v21 = vmul.f32 %v1246_v11, %v464_v20 }
 0x7d3   :  { %468 = vrot.lane.b32.xlu1 %v466_v21, %s1293_s3 }
 0x845   :  { %v469_v22 = vpop.permute.xlu1 %468 }
 0x846   :  { %980 = vst.msk [vmem:[%s1522_s4 + $0x10] sm:$0xff] %vm168_vm2, %v469_v22  ;;  %1122 = vmatmul.mubr.msk.f32.vlgmr.msra.gmra.mrb[4].mxu1 %vm168_vm2, %v469_v22 }
 0x847   :  { %1204 = vmatpush3.bf16.msra.mxu1 %v1337_v8  ;;  %1143 = vmatprep.mubr.msk.f32.mxu1 %vm1290_vm1, %v1291_v4 }
 0x848   :  { %1205 = vmatprep.subr.bf16.mxu1 %v1289_v0 }
 0x84b   :  { %1207 = vmatpush3.bf16.msra.mxu1 %v1350_v12 }
 0x84c   :  { %1214 = vmatprep.subr.bf16.mxu1 %v1289_v0 }
 0x919   :  { %v538_v24 = vpop.f32.mrb[4].mxu1 }
 0x91a   :  { %v542_v25 = vadd.f32 %v538_v24, %v141_v23  ;;  %v1123_v26 = vpop.f32.mrb[5].mxu1 }
 0x91c   :  { %1249 = vtanh.f32 %v542_v25  ;;  %v1005_v28 = vmul.f32 -1.442695, %v542_v25 }
 0x91e   :  { %1251 = vpow2.f32 %v1005_v28 }
 0x926   :  { %v1250_v27 = vpop.eup %1249 }
 0x927   :  { %552 = vrot.lane.b32.xlu0 %v1250_v27, %s1292_s5 }
 0x928   :  { %v1252_v29 = vpop.eup %1251 }
 0x929   :  { %v546_v30 = vadd.f32 1.0, %v1252_v29 }
 0x92b   :  { %1253 = vrcp.f32 %v546_v30 }
 0x935   :  { %v1254_v31 = vpop.eup %1253 }
 0x936   :  { %v550_v34 = vmul.f32 %v1254_v31, %v460_v18 }
 0x999   :  { %v553_v32 = vpop.permute.xlu0 %552 }
 0x99a   :  { %v555_v33 = vmul.f32 %v1254_v31, %v553_v32 }
 0x99c   :  { %557 = vrot.lane.b32.xlu1 %v555_v33, %s1292_s5  ;;  %v161_v33 = vadd.f32 %v1424_v61, %v1371_v13 }
 0xa0e   :  { %v558_v35 = vpop.permute.xlu1 %557 }
 0xa0f   :  { %v560_v36 = vadd.f32 %v558_v35, %v550_v34 }
 0xa11   :  { %1255 = vtanh.f32 %v560_v36 }
 0xa1b   :  { %v1256_v37 = vpop.eup %1255 }
 0xa1c   :  { %563 = vrot.lane.b32.xlu0 %v1256_v37, %s1292_s5 }
 0xa8e   :  { %v564_v38 = vpop.permute.xlu0 %563 }
 0xa8f   :  { %v566_v39 = vmul.f32 %v1254_v31, %v564_v38 }
 0xa91   :  { %568 = vrot.lane.b32.xlu1 %v566_v39, %s1293_s3 }
 0xb03   :  { %v569_v40 = vpop.permute.xlu1 %568 }
 0xb04   :  { %981 = vst.msk [vmem:[%s1522_s4 + $0x18] sm:$0xff] %vm168_vm2, %v569_v40  ;;  %1133 = vmatmul.mubr.msk.f32.vlgmr.msra.gmra.mrb[10].mxu0 %vm168_vm2, %v569_v40 }
 0xb05   :  { %1210 = vmatpush3.bf16.msra.mxu0 %v1337_v8  ;;  %1154 = vmatprep.mubr.msk.f32.mxu0 %vm1290_vm1, %v1291_v4 }
 0xb06   :  { %1211 = vmatprep.subr.bf16.mxu0 %v1289_v0 }
 0xb09   :  { %1213 = vmatpush3.bf16.msra.mxu0 %v1350_v12 }
 0xbd7   :  { %v638_v42 = vpop.f32.mrb[10].mxu0 }
 0xbd8   :  { %v642_v43 = vadd.f32 %v638_v42, %v146_v41  ;;  %v1134_v44 = vpop.f32.mrb[11].mxu0 }
 0xbda   :  { %1257 = vtanh.f32 %v642_v43  ;;  %v1007_v46 = vmul.f32 -1.442695, %v642_v43 }
 0xbdc   :  { %1259 = vpow2.f32 %v1007_v46 }
 0xbe4   :  { %v1258_v45 = vpop.eup %1257 }
 0xbe5   :  { %652 = vrot.lane.b32.xlu0 %v1258_v45, %s1292_s5 }
 0xbe6   :  { %v1260_v47 = vpop.eup %1259 }
 0xbe7   :  { %v646_v48 = vadd.f32 1.0, %v1260_v47 }
 0xbe9   :  { %1261 = vrcp.f32 %v646_v48 }
 0xbf3   :  { %v1262_v49 = vpop.eup %1261 }
 0xbf4   :  { %v650_v52 = vmul.f32 %v1262_v49, %v560_v36 }
 0xc57   :  { %v653_v50 = vpop.permute.xlu0 %652 }
 0xc58   :  { %v655_v51 = vmul.f32 %v1262_v49, %v653_v50 }
 0xc5a   :  { %657 = vrot.lane.b32.xlu1 %v655_v51, %s1292_s5 }
 0xccc   :  { %v658_v53 = vpop.permute.xlu1 %657 }
 0xccd   :  { %v660_v54 = vadd.f32 %v658_v53, %v650_v52 }
 0xccf   :  { %1263 = vtanh.f32 %v660_v54 }
 0xcd9   :  { %v1264_v55 = vpop.eup %1263 }
 0xcda   :  { %663 = vrot.lane.b32.xlu0 %v1264_v55, %s1292_s5 }
 0xd4c   :  { %v664_v56 = vpop.permute.xlu0 %663 }
 0xd4d   :  { %v666_v57 = vmul.f32 %v1262_v49, %v664_v56 }
 0xd4f   :  { %668 = vrot.lane.b32.xlu1 %v666_v57, %s1293_s3 }
 0xdc1   :  { %v669_v58 = vpop.permute.xlu1 %668 }
 0xdc2   :  { %982 = vst.msk [vmem:[%s1522_s4 + $0x20] sm:$0xff] %vm168_vm2, %v669_v58  ;;  %1144 = vmatmul.mubr.msk.f32.vlgmr.msra.gmra.mrb[6].mxu1 %vm168_vm2, %v669_v58 }
 0xdc3   :  { %1216 = vmatpush3.bf16.msra.mxu1 %v1337_v8  ;;  %1165 = vmatprep.mubr.msk.f32.mxu1 %vm1290_vm1, %v1291_v4 }
 0xdc4   :  { %1217 = vmatprep.subr.bf16.mxu1 %v1289_v0 }
 0xdc7   :  { %1219 = vmatpush3.bf16.msra.mxu1 %v1350_v12 }
 0xe95   :  { %v738_v63 = vpop.f32.mrb[6].mxu1 }
 0xe96   :  { %v742_v1 = vadd.f32 %v738_v63, %v151_v60  ;;  %v1145_v2 = vpop.f32.mrb[7].mxu1 }
 0xe98   :  { %1265 = vtanh.f32 %v742_v1  ;;  %v1009_v5 = vmul.f32 -1.442695, %v742_v1 }
 0xe9a   :  { %1267 = vpow2.f32 %v1009_v5 }
 0xea2   :  { %v1266_v3 = vpop.eup %1265 }
 0xea3   :  { %752 = vrot.lane.b32.xlu0 %v1266_v3, %s1292_s5 }
 0xea4   :  { %v1268_v8 = vpop.eup %1267 }
 0xea5   :  { %v746_v6 = vadd.f32 1.0, %v1268_v8 }
 0xea7   :  { %1269 = vrcp.f32 %v746_v6 }
 0xeb1   :  { %v1270_v4 = vpop.eup %1269 }
 0xeb2   :  { %v750_v12 = vmul.f32 %v1270_v4, %v660_v54 }
 0xf15   :  { %v753_v7 = vpop.permute.xlu0 %752 }
 0xf16   :  { %v755_v0 = vmul.f32 %v1270_v4, %v753_v7 }
 0xf18   :  { %757 = vrot.lane.b32.xlu1 %v755_v0, %s1292_s5 }
 0xf8a   :  { %v758_v9 = vpop.permute.xlu1 %757 }
 0xf8b   :  { %v760_v59 = vadd.f32 %v758_v9, %v750_v12 }
 0xf8d   :  { %1271 = vtanh.f32 %v760_v59 }
 0xf97   :  { %v1272_v10 = vpop.eup %1271 }
 0xf98   :  { %763 = vrot.lane.b32.xlu0 %v1272_v10, %s1292_s5 }
0x100a   :  { %v764_v11 = vpop.permute.xlu0 %763 }
0x100b   :  { %v766_v14 = vmul.f32 %v1270_v4, %v764_v11 }
0x100d   :  { %768 = vrot.lane.b32.xlu1 %v766_v14, %s1293_s3 }
0x107f   :  { %v769_v15 = vpop.permute.xlu1 %768 }
0x1080   :  { %983 = vst.msk [vmem:[%s1522_s4 + $0x28] sm:$0xff] %vm168_vm2, %v769_v15  ;;  %1155 = vmatmul.mubr.msk.f32.vlgmr.msra.gmra.mrb[12].mxu0 %vm168_vm2, %v769_v15 }
0x1153   :  { %v838_v17 = vpop.f32.mrb[12].mxu0 }
0x1154   :  { %v842_v18 = vadd.f32 %v838_v17, %v156_v16  ;;  %v1156_v19 = vpop.f32.mrb[13].mxu0 }
0x1156   :  { %1273 = vtanh.f32 %v842_v18  ;;  %v1011_v21 = vmul.f32 -1.442695, %v842_v18 }
0x1158   :  { %1275 = vpow2.f32 %v1011_v21 }
0x1160   :  { %v1274_v20 = vpop.eup %1273 }
0x1161   :  { %852 = vrot.lane.b32.xlu0 %v1274_v20, %s1292_s5 }
0x1162   :  { %v1276_v22 = vpop.eup %1275 }
0x1163   :  { %v846_v23 = vadd.f32 1.0, %v1276_v22 }
0x1165   :  { %1277 = vrcp.f32 %v846_v23 }
0x116f   :  { %v1278_v24 = vpop.eup %1277 }
0x1170   :  { %v850_v27 = vmul.f32 %v1278_v24, %v760_v59 }
0x11d3   :  { %v853_v25 = vpop.permute.xlu0 %852 }
0x11d4   :  { %v855_v26 = vmul.f32 %v1278_v24, %v853_v25 }
0x11d6   :  { %857 = vrot.lane.b32.xlu1 %v855_v26, %s1292_s5 }
0x1248   :  { %v858_v28 = vpop.permute.xlu1 %857 }
0x1249   :  { %v860_v62 = vadd.f32 %v858_v28, %v850_v27 }
0x124b   :  { %1279 = vtanh.f32 %v860_v62 }
0x1255   :  { %v1280_v29 = vpop.eup %1279 }
0x1256   :  { %863 = vrot.lane.b32.xlu0 %v1280_v29, %s1292_s5 }
0x12c8   :  { %v864_v30 = vpop.permute.xlu0 %863 }
0x12c9   :  { %v866_v31 = vmul.f32 %v1278_v24, %v864_v30 }
0x12cb   :  { %868 = vrot.lane.b32.xlu1 %v866_v31, %s1293_s3 }
0x133d   :  { %v869_v32 = vpop.permute.xlu1 %868 }
0x133e   :  { %984 = vst.msk [vmem:[%s1522_s4 + $0x30] sm:$0xff] %vm168_vm2, %v869_v32  ;;  %1166 = vmatmul.mubr.msk.f32.vlgmr.msra.gmra.mrb[8].mxu1 %vm168_vm2, %v869_v32 }
0x1411   :  { %v938_v34 = vpop.f32.mrb[8].mxu1 }
0x1412   :  { %v942_v35 = vadd.f32 %v938_v34, %v161_v33  ;;  %v1167_v36 = vpop.f32.mrb[9].mxu1 }
0x1414   :  { %1281 = vtanh.f32 %v942_v35  ;;  %v1013_v38 = vmul.f32 -1.442695, %v942_v35 }
0x1416   :  { %1283 = vpow2.f32 %v1013_v38 }
0x141e   :  { %v1282_v37 = vpop.eup %1281 }
0x141f   :  { %952 = vrot.lane.b32.xlu0 %v1282_v37, %s1292_s5 }
0x1420   :  { %v1284_v39 = vpop.eup %1283 }
0x1421   :  { %v946_v40 = vadd.f32 1.0, %v1284_v39 }
0x1423   :  { %1285 = vrcp.f32 %v946_v40 }
0x142d   :  { %v1286_v41 = vpop.eup %1285 }
0x142e   :  { %v950_v44 = vmul.f32 %v1286_v41, %v860_v62 }
0x1491   :  { %v953_v42 = vpop.permute.xlu0 %952 }
0x1492   :  { %v955_v43 = vmul.f32 %v1286_v41, %v953_v42 }
0x1494   :  { %957 = vrot.lane.b32.xlu1 %v955_v43, %s1292_s5 }
0x1506   :  { %v958_v45 = vpop.permute.xlu1 %957 }
0x1507   :  { %v960_v13 = vadd.f32 %v958_v45, %v950_v44 }
0x1509   :  { %1287 = vtanh.f32 %v960_v13 }
0x1513   :  { %v1288_v61 = vpop.eup %1287 }
0x1514   :  { %963 = vrot.lane.b32.xlu0 %v1288_v61, %s1292_s5 }
0x1586   :  { %v964_v46 = vpop.permute.xlu0 %963 }
0x1587   :  { %v966_v47 = vmul.f32 %v1286_v41, %v964_v46 }
0x1589   :  { %968 = vrot.lane.b32.xlu1 %v966_v47, %s1293_s3 }
0x15fb   :  { %v969_v48 = vpop.permute.xlu1 %968 }
0x15fc   :  { %985 = vst.msk [vmem:[%s1522_s4 + $0x38] sm:$0xff] %vm168_vm2, %v969_v48 }

</bundles_post_ra>
